<compile_context>
chip_gen: v5e
topology: v5e:2x2
jax: 0.10.0
libtpu: 0.0.40
codegen_flags: <defaults>
</compile_context>

<pallas_src>
import functools
import math

import jax
import jax.numpy as jnp
from jax.experimental import pallas as pl
from jax.experimental.pallas import tpu as pltpu


def _pos_emb_kernel(t_ref, freq_ref, off_ref, out_ref):
    # t_ref:    (TILE_R, 1)   timestamps (int or float)
    # freq_ref: (1, dim)      [freq, freq]                    float32
    # off_ref:  (1, dim)      [0,...,0, pi/2,...,pi/2]        float32
    # out_ref:  (TILE_R, dim)                                 float32
    t = t_ref[...].astype(jnp.float32)                # (TILE_R, 1)
    phase = t * freq_ref[...] + off_ref[...]          # (TILE_R, dim) broadcast
    out_ref[...] = jnp.sin(phase)                     # sin(x + pi/2) == cos(x)


def _pick_tile_rows(rows, dim):
    # Keep 2x (double-buffered) output tiles well under the smallest default
    # scoped VMEM budget:  2 * TILE_R * dim * 4 B  <= ~6 MiB  (plus the
    # in-flight f32 temp this stays < 16 MiB scoped on v5e; fine on v6e/v7x).
    budget_bytes = 6 * 1024 * 1024
    t = budget_bytes // (2 * dim * 4)
    t = max(8, min(int(t), 4096))      # clamp; at least one sublane group
    t = (t // 8) * 8                   # sublane multiple
    rows_up = ((rows + 7) // 8) * 8
    return min(t, rows_up)


@functools.partial(jax.jit, static_argnames=("dim",))
def positional_embedding(timestamp, dim):
    """timestamp: (B, S) any dtype. Returns (B, S, dim) float32."""
    assert dim % 2 == 0
    B, S = timestamp.shape
    half = dim // 2
    rows = B * S

    # Buffers precomputed in the wrapper (deterministic, tiny).
    freq = 1.0 / (10000.0 ** (jnp.arange(half, dtype=jnp.float32) / half))
    freq_cat = jnp.concatenate([freq, freq]).reshape(1, dim)
    offset = jnp.concatenate(
        [jnp.zeros((half,), jnp.float32),
         jnp.full((half,), math.pi / 2, dtype=jnp.float32)]).reshape(1, dim)

    tile_rows = _pick_tile_rows(rows, dim)
    rows_pad = pl.cdiv(rows, tile_rows) * tile_rows

    t2d = timestamp.reshape(rows, 1)
    if rows_pad != rows:
        t2d = jnp.pad(t2d, ((0, rows_pad - rows), (0, 0)))

    out2d = pl.pallas_call(
        _pos_emb_kernel,
        out_shape=jax.ShapeDtypeStruct((rows_pad, dim), jnp.float32),
        grid=(rows_pad // tile_rows,),
        in_specs=[
            pl.BlockSpec((tile_rows, 1), lambda i: (i, 0)),   # timestamps
            pl.BlockSpec((1, dim), lambda i: (0, 0)),         # freq_cat
            pl.BlockSpec((1, dim), lambda i: (0, 0)),         # phase offset
        ],
        out_specs=pl.BlockSpec((tile_rows, dim), lambda i: (i, 0)),
        compiler_params=pltpu.CompilerParams(
            dimension_semantics=("parallel",)),
    )(t2d, freq_cat, offset)

    return out2d[:rows].reshape(B, S, dim)


if __name__ == "__main__":
    key = jax.random.PRNGKey(0)
    B, S, dim = 2, 8, 32
    half = dim // 2

    # Integer timestamps, as typical for diffusion timestep embeddings.
    timestamp = jax.random.randint(key, (B, S), 0, 1000, dtype=jnp.int32)

    out = positional_embedding(timestamp, dim)
    out = jax.block_until_ready(out)

    # Pure-JAX reference mirroring the torch forward.
    freq = 1.0 / (10000.0 ** (jnp.arange(half, dtype=jnp.float32) / half))
    x = timestamp.astype(jnp.float32)[..., None] * freq.reshape(1, 1, half)
    ref = jnp.concatenate((jnp.sin(x), jnp.cos(x)), axis=-1)

    assert out.shape == (B, S, dim)
    assert out.dtype == jnp.float32
    # atol 1e-4: sin(x + fl(pi/2)) vs cos(x) can differ by ~0.5 ulp of |x|
    # (~3e-5 at x ~ 1e3) due to fp32 rounding of the phase add; the math is
    # otherwise identical to the torch reference.
    assert jnp.allclose(out, ref, atol=1e-4, rtol=1e-4), \
        float(jnp.max(jnp.abs(out - ref)))

    print("KERNEL_OK")
</pallas_src>

<mosaic_0001>
module attributes {stable_mosaic.version = 11 : i64} {
  func.func @_pos_emb_kernel(%arg0: i32, %arg1: memref<16x1xi32, #tpu.memory_space<vmem>>, %arg2: memref<1x32xf32, #tpu.memory_space<vmem>>, %arg3: memref<1x32xf32, #tpu.memory_space<vmem>>, %arg4: memref<16x32xf32, #tpu.memory_space<vmem>>) attributes {dimension_semantics = [#tpu.dimension_semantics<parallel>], iteration_bounds = array<i64: 1>, scalar_prefetch = 0 : i64, scratch_operands = 0 : i64, tpu.core_type = #tpu.core_type<tc>, window_params = [{transform_indices = @transform_0, window_bounds = array<i64: 16, 1>}, {pipeline_mode = #tpu.pipeline_mode<synchronous>, transform_indices = @transform_1, window_bounds = array<i64: 1, 32>}, {pipeline_mode = #tpu.pipeline_mode<synchronous>, transform_indices = @transform_2, window_bounds = array<i64: 1, 32>}, {transform_indices = @transform_3, window_bounds = array<i64: 16, 32>}]} {
    %c0 = arith.constant 0 : index
    %c0_0 = arith.constant 0 : index
    %0 = vector.load %arg1[%c0, %c0_0] : memref<16x1xi32, #tpu.memory_space<vmem>>, vector<16x1xi32>
    %1 = arith.sitofp %0 : vector<16x1xi32> to vector<16x1xf32>
    %c0_1 = arith.constant 0 : index
    %c0_2 = arith.constant 0 : index
    %2 = vector.load %arg2[%c0_1, %c0_2] : memref<1x32xf32, #tpu.memory_space<vmem>>, vector<1x32xf32>
    %3 = vector.broadcast %1 : vector<16x1xf32> to vector<16x32xf32>
    %4 = vector.broadcast %2 : vector<1x32xf32> to vector<16x32xf32>
    %5 = arith.mulf %3, %4 : vector<16x32xf32>
    %c0_3 = arith.constant 0 : index
    %c0_4 = arith.constant 0 : index
    %6 = vector.load %arg3[%c0_3, %c0_4] : memref<1x32xf32, #tpu.memory_space<vmem>>, vector<1x32xf32>
    %7 = vector.broadcast %6 : vector<1x32xf32> to vector<16x32xf32>
    %8 = arith.addf %5, %7 : vector<16x32xf32>
    %9 = math.sin %8 : vector<16x32xf32>
    %c0_5 = arith.constant 0 : index
    %c0_6 = arith.constant 0 : index
    %10 = vector.load %arg4[%c0_5, %c0_6] : memref<16x32xf32, #tpu.memory_space<vmem>>, vector<16x32xf32>
    tpu.vector_store %arg4[%c0_5, %c0_6], %9 {strides = array<i32>} : memref<16x32xf32, #tpu.memory_space<vmem>>, vector<16x32xf32>,
    return
  }
  func.func @transform_0(%arg0: i32) -> (i32, i32) {
    %c0_i32 = arith.constant 0 : i32
    %c0_i32_0 = arith.constant 0 : i32
    return %arg0, %c0_i32 : i32, i32
  }
  func.func @transform_1(%arg0: i32) -> (i32, i32) {
    %c0_i32 = arith.constant 0 : i32
    %c0_i32_0 = arith.constant 0 : i32
    %c0_i32_1 = arith.constant 0 : i32
    return %c0_i32, %c0_i32_0 : i32, i32
  }
  func.func @transform_2(%arg0: i32) -> (i32, i32) {
    %c0_i32 = arith.constant 0 : i32
    %c0_i32_0 = arith.constant 0 : i32
    %c0_i32_1 = arith.constant 0 : i32
    return %c0_i32, %c0_i32_0 : i32, i32
  }
  func.func @transform_3(%arg0: i32) -> (i32, i32) {
    %c0_i32 = arith.constant 0 : i32
    %c0_i32_0 = arith.constant 0 : i32
    return %arg0, %c0_i32 : i32, i32
  }
}

</mosaic_0001>

<bundles_post_ra>
// kernel: positional_embedding.1
= control target key start
LH: loop header
LB: loop body
LE: loop exit
PB: predicated region body
PF: predicated region fallthrough
CT: control target
= control target key end

     0   :  { %v417_v1 = vmov 0   ;;  %s606_s0 = inlined_call_operand.vmem [shape: s32[16,1], index: 0, kind: input, shape index: {}]   ;;  %s607_s1 = inlined_call_operand.vmem [shape: f32[1,32], index: 1, kind: input, shape index: {}]   ;;  %s608_s2 = inlined_call_operand.vmem [shape: f32[1,32], index: 2, kind: input, shape index: {}]   ;;  %s609_s3 = inlined_call_operand.hbm [shape: f32[16,32], index: 3, kind: output, shape index: {}]  }
   0x1   :  { %v15_v0 = vld [vmem:[%s606_s0] sm:$0xff]  ;;  %388 = vset.pattern.permute.xlu0 %v417_v1  ;;  %v16_v3 = vld [vmem:[%s606_s0 + $0x8] sm:$0xff] }
   0x2   :  { %v17_v2 = vcvt.s32.f32 %v15_v0 }
   0x4   :  { %22 = vperm.xlu0 %388, %v17_v2  }
   0x5   :  { %8 = vsyncpa [#allocation3], 0  ;;  %v18_v4 = vcvt.s32.f32 %v16_v3  ;;  %v389_v5 = vld [vmem:[%s607_s1] ss:$0 sm:$0xff]  ;;  %v418_v30 = vmov 683565275  }
   0x6   :  { %v390_v6 = vld [vmem:[%s608_s2] ss:$0 sm:$0xff]  ;;  %v419_v32 = vmov 2475754826   ;;  %v420_v36 = vmov 2131351028  }
   0x7   :  { %v421_v39 = vmov 2102212464   ;;  %v422_v42 = vmov 920167782   ;;  %v423_v45 = vmov 1326507024  }
   0x8   :  { %s424_s0 = smov [#allocation2]   ;;  %s360_s21 = sshll.u32 %s609_s3, 4  ;;  %s361_s21 = int_to_ptr.hbm [resolvable:$true] %s360_s21 }
   0x9   :  { %s358_s1 = sshll.u32 %s424_s0, 4  ;;  %s425_s22 = smov 128   ;;  %s359_s1 = int_to_ptr.vmem [resolvable:$true] %s358_s1 }
   0xa   :  { %s426_s23 = smov 8  }
   0xc   :  { %27 = vperm.xlu0 %388, %v18_v4  }
  0x76   :  { %v23_v7 = vpop.permute.xlu0 %22 }
  0x77   :  { %v33_v8 = vmul.f32 %v389_v5, %v23_v7 }
  0x79   :  { %v460_v9 = vadd.f32 %v390_v6, %v33_v8 }
  0x7b   :  { %v41_v10 = vand.u32 2147483647, %v460_v9  ;;  %v44_v11 = vand.u32 2139095040, %v460_v9 }
  0x7d   :  { %v45_v12 = vshrl.u32 %v44_v11, 23  ;;  %v48_v13 = vand.u32 8388607, %v41_v10 }
  0x7e   :  { %v28_v14 = vpop.permute.xlu0 %27 }
  0x7f   :  { %v372_v15 = vadd.s32 4294967169, %v45_v12  ;;  %v49_v16 = vor.u32 8388608, %v48_v13  ;;  %v34_v17 = vmul.f32 %v389_v5, %v28_v14 }
  0x81   :  { %v51_v18 = vadd.s32 1, %v372_v15  ;;  %v466_v19 = vadd.f32 %v390_v6, %v34_v17  ;;  %v468_v20 = vshll.u32 %v49_v16, 8 }
  0x83   :  { %vm52_vm0 = vcmp.gt.s32.totalorder %v51_v18, 0  ;;  %v196_v22 = vand.u32 2147483647, %v466_v19  ;;  %v199_v23 = vand.u32 2139095040, %v466_v19  ;;  %v90_v26 = vand.u32 65535, %v468_v20 }
  0x84   :  { %v53_v21 = vsel %vm52_vm0, %v51_v18, 0  ;;  %v91_v27 = vshrl.u32 %v468_v20, 16 }
  0x85   :  { %v55_v24 = vand.u32 31, %v53_v21  ;;  %v200_v28 = vshrl.u32 %v199_v23, 23  ;;  %v54_v29 = vshrl.u32 %v53_v21, 5  ;;  %v478_v34 = vand.u32 8388607, %v196_v22 }
  0x87   :  { %v56_v25 = vsub.s32 32, %v55_v24  ;;  %v58_v31 = vshll.u32 %v418_v30, %v55_v24  ;;  %v61_v33 = vshll.u32 %v419_v32, %v55_v24  ;;  %v64_v38 = vshll.u32 %v420_v36, %v55_v24 }
  0x88   :  { %v67_v41 = vshll.u32 %v421_v39, %v55_v24  ;;  %v70_v44 = vshll.u32 %v422_v42, %v55_v24  ;;  %v375_v50 = vadd.s32 4294967169, %v200_v28  ;;  %vm73_vm1 = vcmp.lt.s32.totalorder %v54_v29, 1 }
  0x89   :  { %v59_v35 = vshrl.u32 %v419_v32, %v56_v25  ;;  %v62_v37 = vshrl.u32 %v420_v36, %v56_v25  ;;  %v65_v40 = vshrl.u32 %v421_v39, %v56_v25  ;;  %v68_v43 = vshrl.u32 %v422_v42, %v56_v25 }
  0x8a   :  { %v71_v46 = vshrl.u32 %v423_v45, %v56_v25  ;;  %vm76_vm2 = vcmp.lt.s32.totalorder %v54_v29, 4  ;;  %v57_v53 = vshrl.u32 %v418_v30, %v56_v25  ;;  %vm75_vm3 = vcmp.lt.s32.totalorder %v54_v29, 3 }
  0x8b   :  { %v60_v47 = vor.u32 %v59_v35, %v58_v31  ;;  %v63_v48 = vor.u32 %v62_v37, %v61_v33  ;;  %v66_v49 = vor.u32 %v65_v40, %v64_v38  ;;  %v69_v51 = vor.u32 %v68_v43, %v67_v41 }
  0x8c   :  { %v72_v52 = vor.u32 %v71_v46, %v70_v44  ;;  %v206_v59 = vadd.s32 1, %v375_v50  ;;  %vm74_vm4 = vcmp.lt.s32.totalorder %v54_v29, 2  ;;  %v204_v7 = vor.u32 8388608, %v478_v34 }
  0x8d   :  { %v78_v54 = vsel %vm76_vm2, %v66_v49, 2102212464  ;;  %v81_v55 = vsel %vm73_vm1, %v60_v47, %v63_v48  ;;  %v85_v56 = vsel %vm73_vm1, %v63_v48, %v66_v49  ;;  %v82_v57 = vsel %vm76_vm2, %v69_v51, 920167782 }
  0x8e   :  { %v86_v58 = vsel %vm76_vm2, %v72_v52, 1326507024  ;;  %v77_v60 = vsel %vm73_vm1, %v57_v53, %v60_v47  ;;  %v83_v61 = vsel %vm75_vm3, %v66_v49, %v82_v57  ;;  %v79_v63 = vsel %vm75_vm3, %v63_v48, %v78_v54 }
  0x8f   :  { %v87_v62 = vsel %vm75_vm3, %v69_v51, %v86_v58  ;;  %v84_v0 = vsel %vm74_vm4, %v81_v55, %v83_v61  ;;  %vm207_vm5 = vcmp.gt.s32.totalorder %v206_v59, 0  ;;  %v490_v8 = vsel %vm74_vm4, %v77_v60, %v79_v63 }
  0x90   :  { %v88_v2 = vsel %vm74_vm4, %v85_v56, %v87_v62  ;;  %v114_v5 = vand.u32 65535, %v84_v0  ;;  %v115_v6 = vshrl.u32 %v84_v0, 16  ;;  %v208_v13 = vsel %vm207_vm5, %v206_v59, 0 }
  0x91   :  { %v92_v3 = vand.u32 65535, %v88_v2  ;;  %v93_v4 = vshrl.u32 %v88_v2, 16  ;;  %v210_v35 = vand.u32 31, %v208_v13  ;;  %v497_v46 = vshrl.u32 %v208_v13, 5 }
  0x92   :  { %v117_v16 = vmul.u32 %v115_v6, %v90_v26  ;;  %v118_v17 = vmul.u32 %v114_v5, %v91_v27  ;;  %v116_v23 = vmul.u32 %v114_v5, %v90_v26  ;;  %v119_v24 = vmul.u32 %v115_v6, %v91_v27 }
  0x93   :  { %v95_v11 = vmul.u32 %v93_v4, %v90_v26  ;;  %v96_v12 = vmul.u32 %v92_v3, %v91_v27  ;;  %v94_v14 = vmul.u32 %v92_v3, %v90_v26  ;;  %v97_v15 = vmul.u32 %v93_v4, %v91_v27 }
  0x94   :  { %v120_v29 = vshll.u32 %v117_v16, 16  ;;  %v121_v31 = vshrl.u32 %v117_v16, 16  ;;  %v122_v34 = vshll.u32 %v118_v17, 16  ;;  %v123_v38 = vshrl.u32 %v118_v17, 16 }
  0x95   :  { %v98_v18 = vshll.u32 %v95_v11, 16  ;;  %v99_v21 = vshrl.u32 %v95_v11, 16  ;;  %v100_v25 = vshll.u32 %v96_v12, 16  ;;  %v101_v28 = vshrl.u32 %v96_v12, 16 }
  0x96   :  { %vm124_vm7 = vc.u32 %v116_v23, %v120_v29  ;;  %v126_v40 = vadd.s32 %v120_v29, %v116_v23  ;;  %v494_v44 = vsub.s32 32, %v210_v35  ;;  %v213_v50 = vshll.u32 %v418_v30, %v210_v35 }
  0x97   :  { %vm102_vm6 = vc.u32 %v94_v14, %v98_v18  ;;  %v104_v33 = vadd.s32 %v98_v18, %v94_v14  ;;  %v125_v43 = vsel %vm124_vm7, 1, %v417_v1  ;;  %v216_v53 = vshll.u32 %v419_v32, %v210_v35 }
  0x98   :  { %v103_v37 = vsel %vm102_vm6, 1, %v417_v1  ;;  %v127_v27 = vadd.s32 %v125_v43, %v119_v24  ;;  %vm128_vm9 = vc.u32 %v126_v40, %v122_v34  ;;  %v500_v49 = vadd.s32 %v126_v40, %v122_v34 }
  0x99   :  { %v105_v41 = vadd.s32 %v103_v37, %v97_v15  ;;  %vm106_vm8 = vc.u32 %v104_v33, %v100_v25  ;;  %v129_v48 = vsel %vm128_vm9, 1, %v417_v1  ;;  %v214_v52 = vshrl.u32 %v419_v32, %v494_v44 }
  0x9a   :  { %v107_v26 = vsel %vm106_vm8, 1, %v417_v1  ;;  %v131_v51 = vadd.s32 %v129_v48, %v127_v27  ;;  %v217_v54 = vshrl.u32 %v420_v36, %v494_v44  ;;  %v219_v56 = vshll.u32 %v420_v36, %v210_v35 }
  0x9b   :  { %v109_v47 = vadd.s32 %v107_v26, %v105_v41  ;;  %v220_v57 = vshrl.u32 %v421_v39, %v494_v44  ;;  %v222_v58 = vshll.u32 %v421_v39, %v210_v35  ;;  %v512_v60 = vor.u32 %v214_v52, %v213_v50 }
  0x9c   :  { %v132_v59 = vadd.s32 %v131_v51, %v121_v31  ;;  %v514_v61 = vor.u32 %v217_v54, %v216_v53  ;;  %v223_v62 = vshrl.u32 %v422_v42, %v494_v44  ;;  %v225_v0 = vshll.u32 %v422_v42, %v210_v35 }
  0x9d   :  { %v110_v55 = vadd.s32 %v109_v47, %v99_v21  ;;  %v221_v63 = vor.u32 %v220_v57, %v219_v56  ;;  %v226_v36 = vshrl.u32 %v423_v45, %v494_v44  ;;  %vm228_vm11 = vcmp.lt.s32.totalorder %v497_v46, 1 }
  0x9e   :  { %v133_v2 = vadd.s32 %v132_v59, %v123_v38  ;;  %v224_v3 = vor.u32 %v223_v62, %v222_v58  ;;  %v526_v4 = vshll.u32 %v204_v7, 8  ;;  %v134_v5 = vmul.u32 %v468_v20, %v490_v8 }
  0x9f   :  { %v518_v32 = vadd.s32 %v110_v55, %v101_v28  ;;  %v227_v39 = vor.u32 %v226_v36, %v225_v0  ;;  %vm231_vm12 = vcmp.lt.s32.totalorder %v497_v46, 4  ;;  %v236_v42 = vsel %vm228_vm11, %v512_v60, %v514_v61 }
  0xa0   :  { %v137_v6 = vadd.s32 1, %v133_v2  ;;  %vm230_vm13 = vcmp.lt.s32.totalorder %v497_v46, 3  ;;  %v237_v45 = vsel %vm231_vm12, %v224_v3, 920167782  ;;  %v240_v7 = vsel %vm228_vm11, %v514_v61, %v221_v63 }
  0xa1   :  { %vm136_vm10 = vc.u32 %v518_v32, %v500_v49  ;;  %v241_v20 = vsel %vm231_vm12, %v227_v39, 1326507024  ;;  %vm229_vm14 = vcmp.lt.s32.totalorder %v497_v46, 2  ;;  %v238_v11 = vsel %vm230_vm13, %v221_v63, %v237_v45 }
  0xa2   :  { %v138_v8 = vsel %vm136_vm10, %v137_v6, %v133_v2  ;;  %v242_v12 = vsel %vm230_vm13, %v224_v3, %v241_v20  ;;  %v239_v14 = vsel %vm229_vm14, %v236_v42, %v238_v11  ;;  %v245_v16 = vand.u32 65535, %v526_v4 }
  0xa3   :  { %v139_v13 = vadd.s32 %v138_v8, %v134_v5  ;;  %v243_v15 = vsel %vm229_vm14, %v240_v7, %v242_v12  ;;  %v246_v17 = vshrl.u32 %v526_v4, 16  ;;  %v270_v23 = vshrl.u32 %v239_v14, 16 }
  0xa4   :  { %v247_v18 = vand.u32 65535, %v243_v15  ;;  %v248_v21 = vshrl.u32 %v243_v15, 16  ;;  %v269_v25 = vand.u32 65535, %v239_v14  ;;  %v233_v36 = vsel %vm231_vm12, %v221_v63, 2102212464 }
  0xa5   :  { %v140_v24 = vadd.s32 536870912, %v139_v13  ;;  %v272_v33 = vmul.u32 %v270_v23, %v245_v16  ;;  %v274_v54 = vmul.u32 %v270_v23, %v246_v17  ;;  %v212_v3 = vshrl.u32 %v418_v30, %v494_v44 }
  0xa6   :  { %v250_v28 = vmul.u32 %v248_v21, %v245_v16  ;;  %v251_v29 = vmul.u32 %v247_v18, %v246_v17  ;;  %v249_v34 = vmul.u32 %v247_v18, %v245_v16  ;;  %v252_v38 = vmul.u32 %v248_v21, %v246_v17 }
  0xa7   :  { %v554_v31 = vshrl.u32 %v140_v24, 30  ;;  %v271_v40 = vmul.u32 %v269_v25, %v245_v16  ;;  %v275_v41 = vshll.u32 %v272_v33, 16  ;;  %v273_v27 = vmul.u32 %v269_v25, %v246_v17 }
  0xa8   :  { %v253_v35 = vshll.u32 %v250_v28, 16  ;;  %v255_v43 = vshll.u32 %v251_v29, 16  ;;  %v254_v50 = vshrl.u32 %v250_v28, 16  ;;  %v256_v39 = vshrl.u32 %v251_v29, 16 }
  0xa9   :  { %v142_v37 = vshll.u32 %v554_v31, 30  ;;  %vm279_vm1 = vc.u32 %v271_v40, %v275_v41  ;;  %v277_v56 = vshll.u32 %v273_v27, 16  ;;  %v281_v58 = vadd.s32 %v275_v41, %v271_v40 }
  0xaa   :  { %vm257_vm15 = vc.u32 %v249_v34, %v253_v35  ;;  %v259_v26 = vadd.s32 %v253_v35, %v249_v34  ;;  %v280_v57 = vsel %vm279_vm1, 1, %v417_v1  ;;  %v276_v42 = vshrl.u32 %v272_v33, 16 }
  0xab   :  { %v143_v47 = vsub.s32 %v139_v13, %v142_v37  ;;  %v258_v48 = vsel %vm257_vm15, 1, %v417_v1  ;;  %v282_v62 = vadd.s32 %v280_v57, %v274_v54  ;;  %vm283_vm3 = vc.u32 %v281_v58, %v277_v56 }
  0xac   :  { %v260_v51 = vadd.s32 %v258_v48, %v252_v38  ;;  %vm261_vm0 = vc.u32 %v259_v26, %v255_v43  ;;  %v284_v5 = vsel %vm283_vm3, 1, %v417_v1  ;;  %v232_v7 = vsel %vm228_vm11, %v212_v3, %v512_v60 }
  0xad   :  { %vm144_vm2 = vcmp.lt.s32.totalorder %v143_v47, 0  ;;  %v145_v52 = vsub.s32 0, %v143_v47  ;;  %v262_v53 = vsel %vm261_vm0, 1, %v417_v1  ;;  %v286_v45 = vadd.s32 %v284_v5, %v282_v62 }
  0xae   :  { %v264_v55 = vadd.s32 %v262_v53, %v260_v51  ;;  %v234_v20 = vsel %vm230_vm13, %v514_v61, %v233_v36  ;;  %v278_v8 = vshrl.u32 %v273_v27, 16  ;;  %v135_v30 = vadd.s32 %v500_v49, %v518_v32 }
  0xaf   :  { %v146_v59 = vsel %vm144_vm2, %v145_v52, %v143_v47  ;;  %v287_v11 = vadd.s32 %v286_v45, %v276_v42  ;;  %v285_v1 = vadd.s32 %v281_v58, %v277_v56  ;;  %v235_v14 = vsel %vm229_vm14, %v232_v7, %v234_v20 }
  0xb0   :  { %v147_v0 = vclz %v146_v59  ;;  %v265_v2 = vadd.s32 %v264_v55, %v254_v50  ;;  %v289_v18 = vmul.u32 %v526_v4, %v235_v14  ;;  %vm43_vm6 = vcmp.lt.s32.totalorder %v460_v9, 0 }
  0xb1   :  { %v288_v15 = vadd.s32 %v287_v11, %v278_v8  ;;  %vm582_vm7 = vcmp.le.f32.partialorder %v41_v10, 0.7853982  ;;  %v165_v40 = vsub.s32 4, %v554_v31  ;;  %vm351_vm13 = vcmask 261120  }
  0xb2   :  { %v373_v6 = vadd.s32 4294967294, %v147_v0  ;;  %v266_v63 = vadd.s32 %v265_v2, %v256_v39  ;;  %vm184_vm14 = vweird.f32 %v460_v9  ;;  %vm198_vm15 = vcmp.lt.s32.totalorder %v466_v19, 0 }
  0xb3   :  { %v292_v61 = vadd.s32 1, %v288_v15  ;;  %v166_v51 = vsel %vm43_vm6, %v165_v40, %v554_v31  ;;  %vm197_vm0 = vcmp.le.f32.partialorder %v196_v22, 0.7853982 }
  0xb4   :  { %vm374_vm4 = vcmp.lt.s32.totalorder %v373_v6, 0  ;;  %vm291_vm5 = vc.u32 %v266_v63, %v285_v1  ;;  %v168_v54 = vsel %vm582_vm7, 0, %v166_v51  ;;  %v290_v59 = vadd.s32 %v285_v1, %v266_v63 }
  0xb5   :  { %v150_v44 = vsel %vm374_vm4, 0, %v373_v6  ;;  %v293_v24 = vsel %vm291_vm5, %v292_v61, %v288_v15  ;;  %v185_v36 = vadd.s32 3, %v168_v54  ;;  %vm339_vm4 = vweird.f32 %v466_v19 }
  0xb6   :  { %v151_v12 = vsub.s32 32, %v150_v44  ;;  %v155_v13 = vsub.s32 4294967266, %v150_v44  ;;  %v152_v60 = vshll.u32 %v143_v47, %v150_v44  ;;  %v294_v25 = vadd.s32 %v293_v24, %v289_v18 }
  0xb7   :  { %v186_v20 = vand.u32 3, %v185_v36 }
  0xb8   :  { %v153_v16 = vshrl.u32 %v135_v30, %v151_v12  ;;  %v156_v17 = vadd.s32 127, %v155_v13  ;;  %v295_v32 = vadd.s32 536870912, %v294_v25 }
  0xb9   :  { %vm187_vm10 = vcmp.lt.s32.totalorder %v186_v20, 2  ;;  %vm188_vm11 = vcmp.eq.s32.totalorder %v186_v20, 0  ;;  %vm191_vm12 = vcmp.eq.s32.totalorder %v186_v20, 2 }
  0xba   :  { %v154_v21 = vor.u32 %v153_v16, %v152_v60  ;;  %v157_v23 = vshll.u32 %v156_v17, 23  ;;  %v576_v33 = vshrl.u32 %v295_v32, 30 }
  0xbc   :  { %v158_v49 = vor.u32 4788187, %v157_v23  ;;  %v161_v29 = vcvt.s32.f32 %v154_v21  ;;  %v297_v34 = vshll.u32 %v576_v33, 30  ;;  %v320_v18 = vsub.s32 4, %v576_v33 }
  0xbe   :  { %v159_v28 = vand.u32 2147483647, %v158_v49  ;;  %v298_v37 = vsub.s32 %v294_v25, %v297_v34 }
  0xc0   :  { %v162_v46 = vmul.f32 %v161_v29, %v159_v28  ;;  %vm299_vm8 = vcmp.lt.s32.totalorder %v298_v37, 0  ;;  %v300_v43 = vsub.s32 0, %v298_v37 }
  0xc2   :  { %v163_v35 = vxor.u32 2147483648, %v162_v46  ;;  %v301_v27 = vsel %vm299_vm8, %v300_v43, %v298_v37 }
  0xc3   :  { %v302_v48 = vclz %v301_v27 }
  0xc4   :  { %v164_v38 = vsel %vm43_vm6, %v163_v35, %v162_v46 }
  0xc5   :  { %v167_v41 = vsel %vm582_vm7, %v460_v9, %v164_v38  ;;  %v376_v52 = vadd.s32 4294967294, %v302_v48  ;;  %v321_v9 = vsel %vm198_vm15, %v320_v18, %v576_v33 }
  0xc6   :  { %v169_v26 = vmul.f32 %v167_v41, %v167_v41  ;;  %v323_v28 = vsel %vm197_vm0, 0, %v321_v9 }
  0xc7   :  { %vm377_vm9 = vcmp.lt.s32.totalorder %v376_v52, 0 }
  0xc8   :  { %v177_v47 = vmul.f32 -0.00019511016, %v169_v26  ;;  %v170_v50 = vmul.f32 -0.001358992, %v169_v26  ;;  %v305_v57 = vsel %vm377_vm9, 0, %v376_v52 }
  0xc9   :  { %v306_v62 = vsub.s32 32, %v305_v57  ;;  %v310_v0 = vsub.s32 4294967266, %v305_v57  ;;  %v307_v39 = vshll.u32 %v298_v37, %v305_v57  ;;  %v340_v37 = vadd.s32 3, %v323_v28 }
  0xca   :  { %v178_v10 = vadd.f32 0.008332121, %v177_v47  ;;  %v171_v53 = vadd.f32 0.041655596, %v170_v50 }
  0xcb   :  { %v308_v5 = vshrl.u32 %v290_v59, %v306_v62  ;;  %v311_v31 = vadd.s32 127, %v310_v0 }
  0xcc   :  { %v179_v55 = vmul.f32 %v178_v10, %v169_v26  ;;  %v172_v56 = vmul.f32 %v171_v53, %v169_v26 }
  0xcd   :  { %v309_v45 = vor.u32 %v308_v5, %v307_v39  ;;  %v312_v7 = vshll.u32 %v311_v31, 23 }
  0xce   :  { %v180_v58 = vadd.f32 -0.16666654, %v179_v55  ;;  %v173_v2 = vadd.f32 -0.4999988, %v172_v56 }
  0xcf   :  { %v313_v30 = vor.u32 4788187, %v312_v7  ;;  %v316_v63 = vcvt.s32.f32 %v309_v45 }
  0xd0   :  { %v181_v3 = vmul.f32 %v180_v58, %v169_v26  ;;  %v174_v6 = vmul.f32 %v173_v2, %v169_v26 }
  0xd1   :  { %v314_v13 = vand.u32 2147483647, %v313_v30 }
  0xd2   :  { %v182_v42 = vadd.f32 1.0, %v181_v3  ;;  %v175_v8 = vadd.f32 1.0, %v174_v6 }
  0xd3   :  { %v317_v1 = vmul.f32 %v316_v63, %v314_v13 }
  0xd4   :  { %v183_v11 = vmul.f32 %v182_v42, %v167_v41  ;;  %v192_v44 = vxor.u32 2147483648, %v175_v8  ;;  %v341_v41 = vand.u32 3, %v340_v37 }
  0xd5   :  { %v318_v16 = vxor.u32 2147483648, %v317_v1 }
  0xd6   :  { %v189_v12 = vxor.u32 2147483648, %v183_v11  ;;  %v193_v15 = vsel %vm191_vm12, %v192_v44, %v183_v11  ;;  %vm343_vm1 = vcmp.eq.s32.totalorder %v341_v41, 0  ;;  %vm346_vm2 = vcmp.eq.s32.totalorder %v341_v41, 2 }
  0xd7   :  { %v319_v61 = vsel %vm198_vm15, %v318_v16, %v317_v1  ;;  %vm342_vm3 = vcmp.lt.s32.totalorder %v341_v41, 2 }
  0xd8   :  { %v190_v14 = vsel %vm188_vm11, %v175_v8, %v189_v12  ;;  %v322_v21 = vsel %vm197_vm0, %v466_v19, %v319_v61 }
  0xd9   :  { %v194_v60 = vsel %vm187_vm10, %v190_v14, %v193_v15  ;;  %v324_v23 = vmul.f32 %v322_v21, %v322_v21 }
  0xda   :  { %v195_v17 = vsel %vm184_vm14, nan, %v194_v60 }
  0xdb   :  { %352 = vst.msk [vmem:[#allocation2] sm:$0xff] %vm351_vm13, %v195_v17  ;;  %v332_v24 = vmul.f32 -0.00019511016, %v324_v23  ;;  %v325_v25 = vmul.f32 -0.001358992, %v324_v23 }
  0xdd   :  { %v333_v49 = vadd.f32 0.008332121, %v332_v24  ;;  %v326_v32 = vadd.f32 0.041655596, %v325_v25 }
  0xdf   :  { %v334_v29 = vmul.f32 %v333_v49, %v324_v23  ;;  %v327_v46 = vmul.f32 %v326_v32, %v324_v23 }
  0xe1   :  { %v335_v34 = vadd.f32 -0.16666654, %v334_v29  ;;  %v328_v35 = vadd.f32 -0.4999988, %v327_v46 }
  0xe3   :  { %v336_v4 = vmul.f32 %v335_v34, %v324_v23  ;;  %v329_v22 = vmul.f32 %v328_v35, %v324_v23 }
  0xe5   :  { %v337_v38 = vadd.f32 1.0, %v336_v4  ;;  %v330_v40 = vadd.f32 1.0, %v329_v22 }
  0xe7   :  { %v338_v43 = vmul.f32 %v337_v38, %v322_v21  ;;  %v347_v26 = vxor.u32 2147483648, %v330_v40 }
  0xe9   :  { %v344_v33 = vxor.u32 2147483648, %v338_v43  ;;  %v348_v47 = vsel %vm346_vm2, %v347_v26, %v338_v43 }
  0xeb   :  { %v345_v27 = vsel %vm343_vm1, %v330_v40, %v344_v33 }
  0xec   :  { %v349_v48 = vsel %vm342_vm3, %v345_v27, %v348_v47 }
  0xed   :  { %v350_v50 = vsel %vm339_vm4, nan, %v349_v48 }
  0xee   :  { %353 = vst.msk [vmem:[#allocation2 + $0x8] sm:$0xff] %vm351_vm13, %v350_v50 }
  0xef   :  { %366 = dma.vmem_to_hbm [thread:$0]  %s359_s1, 256, %s361_s21, [#allocation3], %s425_s22, %s425_s22, %s426_s23  }
  0xf0   :  { %415 = dma.done.wait [#allocation3], 256  }
  0xf1   :  { %416 = vsyncadd [#allocation3], 4294967040 }
  0xf2   :  { %371 = vsyncpa [#allocation3], 1 }

</bundles_post_ra>
